<compile_context>
chip_gen: v5e
topology: v5e:2x2
jax: 0.10.0
libtpu: 0.0.40
codegen_flags: <defaults>
</compile_context>

<pallas_src>
import functools
import math

import jax
import jax.numpy as jnp
from jax import lax
from jax.experimental import pallas as pl
from jax.experimental.pallas import tpu as pltpu


def _round_up(v, m):
    return ((v + m - 1) // m) * m


# Keep all layer weights resident in VMEM when they (plus working buffers) fit
# this budget.  Conservative: safe on v5e/v6e once the scoped limit is raised,
# and leaves headroom on v7x's 64 MiB physical VMEM.
_RESIDENT_VMEM_BUDGET = 24 << 20


def _vmem_limit(nbytes):
    """Scoped-VMEM limit derived from actual buffer sizes, with headroom."""
    return int(min(max(int(1.25 * nbytes) + (4 << 20), 8 << 20), 48 << 20))


# --------------------------- Pallas kernels ---------------------------------

def _mlp_resident_kernel(x_ref, w_ref, b_ref, cw_ref, cb_ref, o_ref, *,
                         n_layers):
    """Grid = (batch_tiles,).  All weights resident; layer loop unrolled."""
    h = x_ref[...]                                        # (bt, Dpad) bf16
    for l in range(n_layers):                             # small, static -> unrolled
        z = jnp.dot(h, w_ref[l], preferred_element_type=jnp.float32)
        z = jnp.maximum(z + b_ref[l], 0.0)
        h = z.astype(jnp.bfloat16)                        # bf16 hidden state
    # 3x3 conv with H=W=1 and zero padding == matmul with the center tap.
    o = jnp.dot(h, cw_ref[...], preferred_element_type=jnp.float32)
    o_ref[...] = o + cb_ref[...]


def _mlp_streamed_kernel(x_ref, w_ref, b_ref, cw_ref, cb_ref, o_ref, h_ref, *,
                         n_layers):
    """Grid = (batch_tiles, L).  One streamed weight slab per layer step."""
    l = pl.program_id(1)

    @pl.when(l == 0)
    def _init():
        h_ref[...] = x_ref[...]                           # bf16 -> bf16

    z = jnp.dot(h_ref[...], w_ref[...], preferred_element_type=jnp.float32)
    zb = jnp.maximum(z + b_ref[...], 0.0).astype(jnp.bfloat16)
    h_ref[...] = zb                                       # bf16 hidden state

    @pl.when(l == n_layers - 1)
    def _finalize():
        o = jnp.dot(zb, cw_ref[...], preferred_element_type=jnp.float32)
        o_ref[...] = o + cb_ref[...]


def fused_mlp_upsample(x_pad, w_stack, b_stack, conv_w_mat, conv_b_mat, *, bt):
    """x_pad: (Bp, Dpad) bf16, w_stack: (L, Dpad, Dpad) bf16,
    b_stack: (L, 1, Dpad) f32, conv_w_mat: (Dpad, Cpad) bf16,
    conv_b_mat: (1, Cpad) f32.  Returns (Bp, Cpad) f32."""
    Bp, Dpad = x_pad.shape
    L = w_stack.shape[0]
    Cpad = conv_w_mat.shape[-1]

    # Conservative buffer accounting (count everything double-buffered).
    common = (2 * bt * Dpad * 2          # x blocks (bf16)
              + 2 * Dpad * Cpad * 2      # conv weight (bf16)
              + 2 * Cpad * 4             # conv bias (f32)
              + 2 * bt * Cpad * 4)       # output blocks (f32)
    resident_bytes = common + 2 * L * Dpad * Dpad * 2 + 2 * L * Dpad * 4
    streamed_bytes = (common + 2 * Dpad * Dpad * 2 + 2 * Dpad * 4
                      + bt * Dpad * 2)   # bf16 hidden scratch

    if resident_bytes <= _RESIDENT_VMEM_BUDGET:
        # ---------------- resident-weights fast path ----------------
        kernel = functools.partial(_mlp_resident_kernel, n_layers=L)
        return pl.pallas_call(
            kernel,
            out_shape=jax.ShapeDtypeStruct((Bp, Cpad), jnp.float32),
            grid_spec=pltpu.PrefetchScalarGridSpec(
                num_scalar_prefetch=0,
                grid=(Bp // bt,),
                in_specs=[
                    pl.BlockSpec((bt, Dpad), lambda b: (b, 0)),           # x
                    pl.BlockSpec((L, Dpad, Dpad), lambda b: (0, 0, 0)),   # all W (resident)
                    pl.BlockSpec((L, 1, Dpad), lambda b: (0, 0, 0)),      # all biases
                    pl.BlockSpec((Dpad, Cpad), lambda b: (0, 0)),         # conv W
                    pl.BlockSpec((1, Cpad), lambda b: (0, 0)),            # conv b
                ],
                out_specs=pl.BlockSpec((bt, Cpad), lambda b: (b, 0)),
            ),
            compiler_params=pltpu.CompilerParams(
                dimension_semantics=("parallel",),
                vmem_limit_bytes=_vmem_limit(resident_bytes)),
        )(x_pad, w_stack, b_stack, conv_w_mat, conv_b_mat)

    # ---------------- streamed-layer fallback (large widths) ----------------
    # TODO(synk): for very large Dpad on v7x (64 MiB VMEM), additionally tile
    # the streamed weight slab along N/K instead of loading a full (Dpad,Dpad).
    kernel = functools.partial(_mlp_streamed_kernel, n_layers=L)
    return pl.pallas_call(
        kernel,
        out_shape=jax.ShapeDtypeStruct((Bp, Cpad), jnp.float32),
        grid_spec=pltpu.PrefetchScalarGridSpec(
            num_scalar_prefetch=0,
            grid=(Bp // bt, L),
            in_specs=[
                pl.BlockSpec((bt, Dpad), lambda b, l: (b, 0)),                     # x
                pl.BlockSpec((pl.Squeezed(), Dpad, Dpad), lambda b, l: (l, 0, 0)),  # W_l (streamed)
                pl.BlockSpec((pl.Squeezed(), 1, Dpad), lambda b, l: (l, 0, 0)),     # b_l
                pl.BlockSpec((Dpad, Cpad), lambda b, l: (0, 0)),                   # conv W (resident)
                pl.BlockSpec((1, Cpad), lambda b, l: (0, 0)),                      # conv b
            ],
            out_specs=pl.BlockSpec((bt, Cpad), lambda b, l: (b, 0)),
            scratch_shapes=[pltpu.VMEM((bt, Dpad), jnp.bfloat16)],                 # bf16 hidden
        ),
        compiler_params=pltpu.CompilerParams(
            dimension_semantics=("parallel", "arbitrary"),
            vmem_limit_bytes=_vmem_limit(streamed_bytes)),
    )(x_pad, w_stack, b_stack, conv_w_mat, conv_b_mat)


# ------------------------------ JAX glue ops --------------------------------

def pixel_shuffle(x, scale):
    B, C, H, W = x.shape
    Cout = C // (scale * scale)
    y = x.reshape(B, Cout, scale, scale, H, W)
    y = y.transpose(0, 1, 4, 2, 5, 3)
    return y.reshape(B, Cout, H * scale, W * scale)


def prepare_params(raw):
    """Pad feature dims to multiples of 128 (lane-dense), cast weights to
    bf16, keep biases f32, and pre-extract the conv center tap.
    NOTE: 128 is the correct granule on v5e; on v6e/v7x a 256 granule would
    fill the 256x256 MXU better when the real model width allows it."""
    ws, bs = raw["ws"], raw["bs"]
    D = ws[0].shape[0]
    Dpad = _round_up(D, 128)
    w_stack = jnp.stack(
        [jnp.pad(w, ((0, Dpad - D), (0, Dpad - D))) for w in ws]
    ).astype(jnp.bfloat16)
    b_stack = jnp.stack(
        [jnp.pad(b.reshape(1, -1), ((0, 0), (0, Dpad - D))) for b in bs]
    ).astype(jnp.float32)
    cw = raw["conv_w"][:, :, 1, 1].T                     # (D, Cout) center tap
    Cout = cw.shape[1]
    Cpad = _round_up(Cout, 128)
    conv_w_mat = jnp.pad(cw, ((0, Dpad - D), (0, Cpad - Cout))).astype(jnp.bfloat16)
    conv_b_mat = jnp.pad(raw["conv_b"].reshape(1, -1),
                         ((0, 0), (0, Cpad - Cout))).astype(jnp.float32)
    return dict(w_stack=w_stack, b_stack=b_stack,
                conv_w_mat=conv_w_mat, conv_b_mat=conv_b_mat), D, Cout


def _choose_bt(B):
    """Batch-tile size.  Single full-B tile for small B (best MXU M-fill, no
    extra grid steps); 256-row tiles above that (>= HBM roofline balance of
    the streamed design on v7x, multiple tiles for megacore sharding)."""
    if B <= 256:
        return _round_up(B, 8)
    return 256


def mlp_forward(img, kparams, d_image, cout, scale, *, bt=None):
    """MLP.forward(img, branch_out=False)."""
    B, C, H, W = img.shape
    assert H == 1 and W == 1, "module forward() is only consistent for H==W==1"
    Dpad = kparams["w_stack"].shape[-1]
    x = img.reshape(B, C * H * W).astype(jnp.bfloat16)

    if bt is None:
        bt = _choose_bt(B)
    Bp = _round_up(B, bt)
    x_pad = jnp.zeros((Bp, Dpad), jnp.bfloat16).at[:B, :d_image].set(x)

    out_pad = fused_mlp_upsample(x_pad, kparams["w_stack"], kparams["b_stack"],
                                 kparams["conv_w_mat"], kparams["conv_b_mat"],
                                 bt=bt)
    conv_out = out_pad[:B, :cout].reshape(B, cout, H, W)
    return pixel_shuffle(conv_out, scale)


# --------------------------- deterministic params ---------------------------

def init_params(key, d_image, width, n_fc, scale, num_out_ch=3):
    assert width == d_image, "module forward() requires width == d_image"
    n_middle = n_fc - 2
    L = 1 + n_middle
    keys = jax.random.split(key, 2 * L + 2)
    ws, bs = [], []
    for layer in range(L):
        fan_in = d_image if layer == 0 else width
        bound = 1.0 / math.sqrt(fan_in)
        ws.append(jax.random.uniform(keys[2 * layer], (fan_in, width),
                                     jnp.float32, -bound, bound))
        bs.append(jax.random.uniform(keys[2 * layer + 1], (width,),
                                     jnp.float32, -bound, bound))
    cin, cout = width, scale * scale * num_out_ch
    cb = 1.0 / math.sqrt(cin * 9)
    conv_w = jax.random.uniform(keys[-2], (cout, cin, 3, 3), jnp.float32, -cb, cb)
    conv_b = jax.random.uniform(keys[-1], (cout,), jnp.float32, -cb, cb)
    return dict(ws=ws, bs=bs, conv_w=conv_w, conv_b=conv_b)


# ------------------------------ pure-JAX ref ---------------------------------

def mlp_forward_ref(img, raw, scale):
    """Faithful module forward (full 3x3 conv), same bf16/f32 mixed precision."""
    B, C, H, W = img.shape
    h = img.reshape(B, -1).astype(jnp.float32)
    for w, b in zip(raw["ws"], raw["bs"]):
        z = jnp.dot(h.astype(jnp.bfloat16), w.astype(jnp.bfloat16),
                    preferred_element_type=jnp.float32)
        h = jnp.maximum(z + b.reshape(1, -1), 0.0)
    feat = h.reshape(B, C, H, W)
    conv = lax.conv_general_dilated(
        feat.astype(jnp.bfloat16), raw["conv_w"].astype(jnp.bfloat16),
        (1, 1), ((1, 1), (1, 1)),
        dimension_numbers=("NCHW", "OIHW", "NCHW"),
        preferred_element_type=jnp.float32)
    conv = conv + raw["conv_b"][None, :, None, None]
    return pixel_shuffle(conv, scale)


# ---------------------------------- main -------------------------------------

if __name__ == "__main__":
    # H=W=1 is required by the module (see header); width == d_image == C.
    B, C, H, W = 64, 32, 1, 1
    d_image = C * H * W               # 32
    width = 32
    n_fc = 4                          # -> 3 Linear+ReLU layers
    upscale = 2                       # conv out channels = 4*3 = 12

    key = jax.random.PRNGKey(0)
    k_img, k_par = jax.random.split(key)
    img = jax.random.normal(k_img, (B, C, H, W), jnp.float32)

    raw = init_params(k_par, d_image, width, n_fc, upscale)
    kparams, D, Cout = prepare_params(raw)

    out = jax.block_until_ready(mlp_forward(img, kparams, D, Cout, upscale))
    ref = mlp_forward_ref(img, raw, upscale)

    assert out.shape == (B, 3, H * upscale, W * upscale), out.shape
    assert jnp.allclose(out, ref, rtol=2e-3, atol=2e-3), "mismatch vs JAX reference"
    print("KERNEL_OK")
</pallas_src>

<mosaic_0001>
module attributes {stable_mosaic.version = 11 : i64} {
  func.func @_mlp_resident_kernel(%arg0: i32, %arg1: memref<64x128xbf16, #tpu.memory_space<vmem>>, %arg2: memref<3x128x128xbf16, #tpu.memory_space<vmem>>, %arg3: memref<3x1x128xf32, #tpu.memory_space<vmem>>, %arg4: memref<128x128xbf16, #tpu.memory_space<vmem>>, %arg5: memref<1x128xf32, #tpu.memory_space<vmem>>, %arg6: memref<64x128xf32, #tpu.memory_space<vmem>>) attributes {dimension_semantics = [#tpu.dimension_semantics<parallel>], iteration_bounds = array<i64: 1>, scalar_prefetch = 0 : i64, scratch_operands = 0 : i64, tpu.core_type = #tpu.core_type<tc>, window_params = [{transform_indices = @transform_0, window_bounds = array<i64: 64, 128>}, {pipeline_mode = #tpu.pipeline_mode<synchronous>, transform_indices = @transform_1, window_bounds = array<i64: 3, 128, 128>}, {pipeline_mode = #tpu.pipeline_mode<synchronous>, transform_indices = @transform_2, window_bounds = array<i64: 3, 1, 128>}, {pipeline_mode = #tpu.pipeline_mode<synchronous>, transform_indices = @transform_3, window_bounds = array<i64: 128, 128>}, {pipeline_mode = #tpu.pipeline_mode<synchronous>, transform_indices = @transform_4, window_bounds = array<i64: 1, 128>}, {transform_indices = @transform_5, window_bounds = array<i64: 64, 128>}]} {
    %c0 = arith.constant 0 : index
    %c0_0 = arith.constant 0 : index
    %0 = vector.load %arg1[%c0, %c0_0] : memref<64x128xbf16, #tpu.memory_space<vmem>>, vector<64x128xbf16>
    %c0_1 = arith.constant 0 : index
    %c0_2 = arith.constant 0 : index
    %c0_3 = arith.constant 0 : index
    %1 = vector.load %arg2[%c0_1, %c0_2, %c0_3] : memref<3x128x128xbf16, #tpu.memory_space<vmem>>, vector<1x128x128xbf16>
    %2 = vector.shape_cast %1 : vector<1x128x128xbf16> to vector<128x128xbf16>
    %cst = arith.constant dense<0.000000e+00> : vector<64x128xf32>
    %3 = tpu.matmul %0, %2, %cst {dimension_numbers = #tpu.dot_dimension_numbers<[1], [0], [0], [1], [0, 0, 1, 1], [], []>} : vector<64x128xbf16>, vector<128x128xbf16>, vector<64x128xf32> -> vector<64x128xf32>
    %c0_4 = arith.constant 0 : index
    %c0_5 = arith.constant 0 : index
    %c0_6 = arith.constant 0 : index
    %4 = vector.load %arg3[%c0_4, %c0_5, %c0_6] : memref<3x1x128xf32, #tpu.memory_space<vmem>>, vector<1x1x128xf32>
    %5 = vector.shape_cast %4 : vector<1x1x128xf32> to vector<1x128xf32>
    %6 = vector.broadcast %5 : vector<1x128xf32> to vector<64x128xf32>
    %7 = arith.addf %3, %6 : vector<64x128xf32>
    %cst_7 = arith.constant 0.000000e+00 : f32
    %8 = vector.broadcast %cst_7 : f32 to vector<64x128xf32>
    %9 = arith.maximumf %7, %8 : vector<64x128xf32>
    %10 = arith.truncf %9 : vector<64x128xf32> to vector<64x128xbf16>
    %c1 = arith.constant 1 : index
    %c0_8 = arith.constant 0 : index
    %c0_9 = arith.constant 0 : index
    %11 = vector.load %arg2[%c1, %c0_8, %c0_9] : memref<3x128x128xbf16, #tpu.memory_space<vmem>>, vector<1x128x128xbf16>
    %12 = vector.shape_cast %11 : vector<1x128x128xbf16> to vector<128x128xbf16>
    %cst_10 = arith.constant dense<0.000000e+00> : vector<64x128xf32>
    %13 = tpu.matmul %10, %12, %cst_10 {dimension_numbers = #tpu.dot_dimension_numbers<[1], [0], [0], [1], [0, 0, 1, 1], [], []>} : vector<64x128xbf16>, vector<128x128xbf16>, vector<64x128xf32> -> vector<64x128xf32>
    %c1_11 = arith.constant 1 : index
    %c0_12 = arith.constant 0 : index
    %c0_13 = arith.constant 0 : index
    %14 = vector.load %arg3[%c1_11, %c0_12, %c0_13] : memref<3x1x128xf32, #tpu.memory_space<vmem>>, vector<1x1x128xf32>
    %15 = vector.shape_cast %14 : vector<1x1x128xf32> to vector<1x128xf32>
    %16 = vector.broadcast %15 : vector<1x128xf32> to vector<64x128xf32>
    %17 = arith.addf %13, %16 : vector<64x128xf32>
    %cst_14 = arith.constant 0.000000e+00 : f32
    %18 = vector.broadcast %cst_14 : f32 to vector<64x128xf32>
    %19 = arith.maximumf %17, %18 : vector<64x128xf32>
    %20 = arith.truncf %19 : vector<64x128xf32> to vector<64x128xbf16>
    %c2 = arith.constant 2 : index
    %c0_15 = arith.constant 0 : index
    %c0_16 = arith.constant 0 : index
    %21 = vector.load %arg2[%c2, %c0_15, %c0_16] : memref<3x128x128xbf16, #tpu.memory_space<vmem>>, vector<1x128x128xbf16>
    %22 = vector.shape_cast %21 : vector<1x128x128xbf16> to vector<128x128xbf16>
    %cst_17 = arith.constant dense<0.000000e+00> : vector<64x128xf32>
    %23 = tpu.matmul %20, %22, %cst_17 {dimension_numbers = #tpu.dot_dimension_numbers<[1], [0], [0], [1], [0, 0, 1, 1], [], []>} : vector<64x128xbf16>, vector<128x128xbf16>, vector<64x128xf32> -> vector<64x128xf32>
    %c2_18 = arith.constant 2 : index
    %c0_19 = arith.constant 0 : index
    %c0_20 = arith.constant 0 : index
    %24 = vector.load %arg3[%c2_18, %c0_19, %c0_20] : memref<3x1x128xf32, #tpu.memory_space<vmem>>, vector<1x1x128xf32>
    %25 = vector.shape_cast %24 : vector<1x1x128xf32> to vector<1x128xf32>
    %26 = vector.broadcast %25 : vector<1x128xf32> to vector<64x128xf32>
    %27 = arith.addf %23, %26 : vector<64x128xf32>
    %cst_21 = arith.constant 0.000000e+00 : f32
    %28 = vector.broadcast %cst_21 : f32 to vector<64x128xf32>
    %29 = arith.maximumf %27, %28 : vector<64x128xf32>
    %30 = arith.truncf %29 : vector<64x128xf32> to vector<64x128xbf16>
    %c0_22 = arith.constant 0 : index
    %c0_23 = arith.constant 0 : index
    %31 = vector.load %arg4[%c0_22, %c0_23] : memref<128x128xbf16, #tpu.memory_space<vmem>>, vector<128x128xbf16>
    %cst_24 = arith.constant dense<0.000000e+00> : vector<64x128xf32>
    %32 = tpu.matmul %30, %31, %cst_24 {dimension_numbers = #tpu.dot_dimension_numbers<[1], [0], [0], [1], [0, 0, 1, 1], [], []>} : vector<64x128xbf16>, vector<128x128xbf16>, vector<64x128xf32> -> vector<64x128xf32>
    %c0_25 = arith.constant 0 : index
    %c0_26 = arith.constant 0 : index
    %33 = vector.load %arg5[%c0_25, %c0_26] : memref<1x128xf32, #tpu.memory_space<vmem>>, vector<1x128xf32>
    %34 = vector.broadcast %33 : vector<1x128xf32> to vector<64x128xf32>
    %35 = arith.addf %32, %34 : vector<64x128xf32>
    %c0_27 = arith.constant 0 : index
    %c0_28 = arith.constant 0 : index
    %36 = vector.load %arg6[%c0_27, %c0_28] : memref<64x128xf32, #tpu.memory_space<vmem>>, vector<64x128xf32>
    tpu.vector_store %arg6[%c0_27, %c0_28], %35 {strides = array<i32>} : memref<64x128xf32, #tpu.memory_space<vmem>>, vector<64x128xf32>,
    return
  }
  func.func @transform_0(%arg0: i32) -> (i32, i32) {
    %c0_i32 = arith.constant 0 : i32
    %c0_i32_0 = arith.constant 0 : i32
    return %arg0, %c0_i32 : i32, i32
  }
  func.func @transform_1(%arg0: i32) -> (i32, i32, i32) {
    %c0_i32 = arith.constant 0 : i32
    %c0_i32_0 = arith.constant 0 : i32
    %c0_i32_1 = arith.constant 0 : i32
    %c0_i32_2 = arith.constant 0 : i32
    return %c0_i32, %c0_i32_0, %c0_i32_1 : i32, i32, i32
  }
  func.func @transform_2(%arg0: i32) -> (i32, i32, i32) {
    %c0_i32 = arith.constant 0 : i32
    %c0_i32_0 = arith.constant 0 : i32
    %c0_i32_1 = arith.constant 0 : i32
    %c0_i32_2 = arith.constant 0 : i32
    return %c0_i32, %c0_i32_0, %c0_i32_1 : i32, i32, i32
  }
  func.func @transform_3(%arg0: i32) -> (i32, i32) {
    %c0_i32 = arith.constant 0 : i32
    %c0_i32_0 = arith.constant 0 : i32
    %c0_i32_1 = arith.constant 0 : i32
    return %c0_i32, %c0_i32_0 : i32, i32
  }
  func.func @transform_4(%arg0: i32) -> (i32, i32) {
    %c0_i32 = arith.constant 0 : i32
    %c0_i32_0 = arith.constant 0 : i32
    %c0_i32_1 = arith.constant 0 : i32
    return %c0_i32, %c0_i32_0 : i32, i32
  }
  func.func @transform_5(%arg0: i32) -> (i32, i32) {
    %c0_i32 = arith.constant 0 : i32
    %c0_i32_0 = arith.constant 0 : i32
    return %arg0, %c0_i32 : i32, i32
  }
}

</mosaic_0001>

<bundles_post_ra>
// kernel: tpu_custom_call.1
= control target key start
LH: loop header
LB: loop body
LE: loop exit
PB: predicated region body
PF: predicated region fallthrough
CT: control target
= control target key end

     0   :  { %10 = vsyncpa [#allocation3], 0  ;;  %s955_s0 = inlined_call_operand.hbm [shape: bf16[64,128], index: 0, kind: input, shape index: {}]   ;;  %s956_s1 = inlined_call_operand.hbm [shape: bf16[3,128,128], index: 1, kind: input, shape index: {}]   ;;  %s957_s2 = inlined_call_operand.hbm [shape: f32[3,1,128], index: 2, kind: input, shape index: {}]   ;;  %s958_s3 = inlined_call_operand.hbm [shape: bf16[128,128], index: 3, kind: input, shape index: {}]   ;;  %s959_s4 = inlined_call_operand.vmem [shape: f32[1,128], index: 4, kind: input, shape index: {}]   ;;  %s960_s5 = inlined_call_operand.hbm [shape: f32[64,128], index: 5, kind: output, shape index: {}]  }
   0x1   :  { %11 = vsyncpa [#allocation6], 0 }
   0x2   :  { %12 = vsyncpa [#allocation9], 0 }
   0x3   :  { %13 = vsyncpa [#allocation4], 0  ;;  %s31_s20 = sshll.u32 %s956_s1, 4  ;;  %s896_s21 = smov [#allocation5]   ;;  %s32_s20 = int_to_ptr.hbm [resolvable:$true] %s31_s20 }
   0x4   :  { %s33_s22 = sshll.u32 %s896_s21, 4  ;;  %s18_s25 = sshll.u32 %s955_s0, 4  ;;  %s34_s22 = int_to_ptr.vmem [resolvable:$true] %s33_s22  ;;  %s19_s25 = int_to_ptr.hbm [resolvable:$true] %s18_s25 }
   0x5   :  { %s897_s26 = smov 64   ;;  %s898_s27 = smov 4  }
   0x6   :  { %39 = dma.hbm_to_vmem [thread:$0]  %s32_s20, 3072, %s34_s22, [#allocation6], %s897_s26, %s897_s26, %s898_s27  }
   0x7   :  { %s899_s28 = smov [#allocation2]   ;;  %s44_s7 = sshll.u32 %s957_s2, 4  ;;  %s45_s7 = int_to_ptr.hbm [resolvable:$true] %s44_s7 }
   0x8   :  { %s20_s29 = sshll.u32 %s899_s28, 4  ;;  %s900_s1 = smov [#allocation7]   ;;  %s21_s29 = int_to_ptr.vmem [resolvable:$true] %s20_s29 }
   0x9   :  { %26 = dma.hbm_to_vmem [thread:$0]  %s19_s25, 512, %s21_s29, [#allocation3], %s897_s26, %s897_s26, %s898_s27  }
   0xa   :  { %s46_s8 = sshll.u32 %s900_s1, 4  ;;  %s57_s0 = sshll.u32 %s958_s3, 4  ;;  %s47_s8 = int_to_ptr.vmem [resolvable:$true] %s46_s8  ;;  %s58_s0 = int_to_ptr.hbm [resolvable:$true] %s57_s0 }
   0xb   :  { %s901_s11 = smov 16   ;;  %s902_s12 = smov 1  }
   0xc   :  { %52 = dma.hbm_to_vmem [thread:$0]  %s45_s7, 48, %s47_s8, [#allocation6], %s901_s11, %s901_s11, %s902_s12  }
   0xd   :  { %s903_s13 = smov [#allocation8]  }
   0xe   :  { %s59_s14 = sshll.u32 %s903_s13, 4  ;;  %s60_s14 = int_to_ptr.vmem [resolvable:$true] %s59_s14 }
   0xf   :  { %65 = dma.hbm_to_vmem [thread:$0]  %s58_s0, 1024, %s60_s14, [#allocation9], %s897_s26, %s897_s26, %s898_s27  }
  0x10   :  { %888 = dma.done.wait [#allocation3], 512  }
  0x11   :  { %889 = vsyncadd [#allocation3], 4294966784 }
  0x12   :  { %890 = dma.done.wait [#allocation6], 3120  }
  0x13   :  { %891 = vsyncadd [#allocation6], 4294964176 }
  0x14   :  { %892 = dma.done.wait [#allocation9], 1024  }
  0x15   :  { %893 = vsyncadd [#allocation9], 4294966272  ;;  %v728_v0 = vld [vmem:[#allocation5 + $0x38] sm:$0xff]  ;;  %v727_v1 = vld [vmem:[#allocation5 + $0x30] sm:$0xff]  ;;  %s558_s18 = sshll.u32 %s960_s5, 4  ;;  %s905_s19 = smov 128   ;;  %s559_s18 = int_to_ptr.hbm [resolvable:$true] %s558_s18 }
  0x16   :  { %184 = vmatpush.bf16.msra.mxu0 %v728_v0  ;;  %v726_v2 = vld [vmem:[#allocation5 + $0x28] sm:$0xff]  ;;  %v725_v3 = vld [vmem:[#allocation5 + $0x20] sm:$0xff]  ;;  %v724_v4 = vld [vmem:[#allocation5 + $0x18] sm:$0xff]  ;;  %s906_s20 = smov 8  }
  0x17   :  { %v723_v5 = vld [vmem:[#allocation5 + $0x10] sm:$0xff]  ;;  %v722_v6 = vld [vmem:[#allocation5 + $0x8] sm:$0xff]  ;;  %v721_v7 = vld [vmem:[#allocation5] sm:$0xff] }
  0x18   :  { %v717_v8 = vld [vmem:[#allocation2] sm:$0xff]  ;;  %v718_v9 = vld [vmem:[#allocation2 + $0x8] sm:$0xff]  ;;  %v736_v10 = vld [vmem:[#allocation5 + $0x78] sm:$0xff] }
  0x19   :  { %295 = vmatpush.bf16.msra.mxu1 %v736_v10  ;;  %v735_v11 = vld [vmem:[#allocation5 + $0x70] sm:$0xff]  ;;  %v734_v12 = vld [vmem:[#allocation5 + $0x68] sm:$0xff]  ;;  %v733_v13 = vld [vmem:[#allocation5 + $0x60] sm:$0xff] }
  0x1a   :  { %185 = vmatpush.bf16.msra.mxu0 %v727_v1  ;;  %v719_v14 = vld [vmem:[#allocation2 + $0x10] sm:$0xff]  ;;  %v720_v15 = vld [vmem:[#allocation2 + $0x18] sm:$0xff]  ;;  %v730_v18 = vld [vmem:[#allocation5 + $0x48] sm:$0xff] }
  0x1b   :  { %v732_v16 = vld [vmem:[#allocation5 + $0x58] sm:$0xff]  ;;  %v731_v17 = vld [vmem:[#allocation5 + $0x50] sm:$0xff]  ;;  %v729_v19 = vld [vmem:[#allocation5 + $0x40] sm:$0xff] }
  0x1c   :  { %v764_v21 = vld [vmem:[#allocation7] ss:$0 sm:$0xff]  ;;  %v744_v35 = vld [vmem:[#allocation5 + $0xb8] sm:$0xff]  ;;  %v743_v37 = vld [vmem:[#allocation5 + $0xb0] sm:$0xff] }
  0x1d   :  { %296 = vmatpush.bf16.msra.mxu1 %v735_v11  ;;  %406 = vmatpush.bf16.msra.mxu2 %v744_v35  ;;  %v742_v38 = vld [vmem:[#allocation5 + $0xa8] sm:$0xff]  ;;  %v741_v42 = vld [vmem:[#allocation5 + $0xa0] sm:$0xff]  ;;  %v740_v53 = vld [vmem:[#allocation5 + $0x98] sm:$0xff] }
  0x1e   :  { %186 = vmatpush.bf16.msra.mxu0 %v726_v2  ;;  %v739_v54 = vld [vmem:[#allocation5 + $0x90] sm:$0xff]  ;;  %v738_v55 = vld [vmem:[#allocation5 + $0x88] sm:$0xff]  ;;  %v737_v56 = vld [vmem:[#allocation5 + $0x80] sm:$0xff] }
  0x1f   :  { %v765_v58 = vld [vmem:[#allocation7 + $0x1] ss:$0 sm:$0xff]  ;;  %v751_v10 = vld [vmem:[#allocation8 + $0x30] sm:$0xff]  ;;  %v750_v11 = vld [vmem:[#allocation8 + $0x28] sm:$0xff] }
  0x21   :  { %297 = vmatpush.bf16.msra.mxu1 %v734_v12  ;;  %407 = vmatpush.bf16.msra.mxu2 %v743_v37 }
  0x22   :  { %187 = vmatpush.bf16.msra.mxu0 %v725_v3 }
  0x25   :  { %298 = vmatpush.bf16.msra.mxu1 %v733_v13  ;;  %408 = vmatpush.bf16.msra.mxu2 %v742_v38 }
  0x26   :  { %188 = vmatpush.bf16.msra.mxu0 %v724_v4 }
  0x29   :  { %299 = vmatpush.bf16.msra.mxu1 %v732_v16  ;;  %409 = vmatpush.bf16.msra.mxu2 %v741_v42 }
  0x2a   :  { %189 = vmatpush.bf16.msra.mxu0 %v723_v5 }
  0x2d   :  { %300 = vmatpush.bf16.msra.mxu1 %v731_v17  ;;  %410 = vmatpush.bf16.msra.mxu2 %v740_v53 }
  0x2e   :  { %190 = vmatpush.bf16.msra.mxu0 %v722_v6 }
  0x31   :  { %301 = vmatpush.bf16.msra.mxu1 %v730_v18  ;;  %411 = vmatpush.bf16.msra.mxu2 %v739_v54 }
  0x32   :  { %191 = vmatpush.bf16.msra.mxu0 %v721_v7 }
  0x35   :  { %192 = vmatmul.bf16.vlgmr.msra.gmra.mxu0 %v717_v8  ;;  %302 = vmatpush.bf16.msra.mxu1 %v729_v19  ;;  %v752_v8 = vld [vmem:[#allocation8 + $0x38] sm:$0xff] }
  0x36   :  { %412 = vmatpush.bf16.msra.mxu2 %v738_v55  ;;  %515 = vmatpush.bf16.msra.mxu3 %v752_v8 }
  0x3a   :  { %413 = vmatpush.bf16.msra.mxu2 %v737_v56  ;;  %516 = vmatpush.bf16.msra.mxu3 %v751_v10 }
  0x3e   :  { %517 = vmatpush.bf16.msra.mxu3 %v750_v11 }
  0x45   :  { %197 = vmatmul.bf16.gmra.mxu0 %v718_v9 }
  0x55   :  { %202 = vmatmul.bf16.gmra.mxu0 %v719_v14 }
  0x65   :  { %207 = vmatmul.bf16.gmra.mxu0 %v720_v15  ;;  %v749_v15 = vld [vmem:[#allocation8 + $0x20] sm:$0xff] }
  0x66   :  { %518 = vmatpush.bf16.msra.mxu3 %v749_v15 }
  0xb2   :  { %v193_v20 = vpop.f32.mrf.mxu0 }
  0xb3   :  { %v194_v22 = vadd.f32 %v764_v21, %v193_v20 }
  0xb5   :  { %v213_v25 = vmax.f32 %v194_v22, 0.0 }
  0xba   :  { %v195_v23 = vpop.f32.mrf.mxu0 }
  0xbb   :  { %v196_v24 = vadd.f32 %v764_v21, %v195_v23 }
  0xbd   :  { %v214_v26 = vmax.f32 %v196_v24, 0.0 }
  0xbf   :  { %v221_v27 = vpack.c.bf16 %v214_v26, %v213_v25  ;;  %v748_v26 = vld [vmem:[#allocation8 + $0x18] sm:$0xff] }
  0xc0   :  { %519 = vmatpush.bf16.msra.mxu3 %v748_v26 }
  0xc1   :  { %303 = vmatmul.bf16.vlgmr.msra.gmra.mxu1 %v221_v27  ;;  %v747_v27 = vld [vmem:[#allocation8 + $0x10] sm:$0xff] }
  0xc2   :  { %v198_v28 = vpop.f32.mrf.mxu0 }
  0xc3   :  { %v199_v29 = vadd.f32 %v764_v21, %v198_v28  ;;  %v746_v28 = vld [vmem:[#allocation8 + $0x8] sm:$0xff] }
  0xc4   :  { %520 = vmatpush.bf16.msra.mxu3 %v747_v27 }
  0xc5   :  { %v215_v32 = vmax.f32 %v199_v29, 0.0  ;;  %v745_v29 = vld [vmem:[#allocation8] sm:$0xff] }
  0xc8   :  { %521 = vmatpush.bf16.msra.mxu3 %v746_v28 }
  0xca   :  { %v200_v30 = vpop.f32.mrf.mxu0 }
  0xcb   :  { %v201_v31 = vadd.f32 %v764_v21, %v200_v30 }
  0xcc   :  { %522 = vmatpush.bf16.msra.mxu3 %v745_v29 }
  0xcd   :  { %v216_v33 = vmax.f32 %v201_v31, 0.0  ;;  %v766_v31 = vld [vmem:[#allocation7 + $0x2] ss:$0 sm:$0xff] }
  0xcf   :  { %v222_v34 = vpack.c.bf16 %v216_v33, %v215_v32 }
  0xd1   :  { %308 = vmatmul.bf16.gmra.mxu1 %v222_v34 }
  0xd2   :  { %v203_v36 = vpop.f32.mrf.mxu0 }
  0xd3   :  { %v204_v39 = vadd.f32 %v764_v21, %v203_v36 }
  0xd5   :  { %v217_v43 = vmax.f32 %v204_v39, 0.0 }
  0xda   :  { %v205_v40 = vpop.f32.mrf.mxu0 }
  0xdb   :  { %v206_v41 = vadd.f32 %v764_v21, %v205_v40 }
  0xdd   :  { %v218_v44 = vmax.f32 %v206_v41, 0.0 }
  0xdf   :  { %v223_v45 = vpack.c.bf16 %v218_v44, %v217_v43 }
  0xe1   :  { %313 = vmatmul.bf16.gmra.mxu1 %v223_v45 }
  0xe2   :  { %v208_v46 = vpop.f32.mrf.mxu0 }
  0xe3   :  { %v209_v47 = vadd.f32 %v764_v21, %v208_v46 }
  0xe5   :  { %v219_v50 = vmax.f32 %v209_v47, 0.0 }
  0xea   :  { %v210_v48 = vpop.f32.mrf.mxu0 }
  0xeb   :  { %v211_v49 = vadd.f32 %v764_v21, %v210_v48 }
  0xed   :  { %v220_v51 = vmax.f32 %v211_v49, 0.0 }
  0xef   :  { %v224_v52 = vpack.c.bf16 %v220_v51, %v219_v50 }
  0xf1   :  { %318 = vmatmul.bf16.gmra.mxu1 %v224_v52 }
 0x13e   :  { %v304_v57 = vpop.f32.mrf.mxu1 }
 0x13f   :  { %v305_v59 = vadd.f32 %v765_v58, %v304_v57 }
 0x141   :  { %v324_v62 = vmax.f32 %v305_v59, 0.0  ;;  %v767_v59 = vld [vmem:[%s959_s4] ss:$0 sm:$0xff]  ;;  %s904_s4 = smov [#allocation10]  }
 0x142   :  { %s556_s15 = sshll.u32 %s904_s4, 4  ;;  %s557_s15 = int_to_ptr.vmem [resolvable:$true] %s556_s15 }
 0x146   :  { %v306_v60 = vpop.f32.mrf.mxu1 }
 0x147   :  { %v307_v61 = vadd.f32 %v765_v58, %v306_v60 }
 0x149   :  { %v325_v63 = vmax.f32 %v307_v61, 0.0 }
 0x14b   :  { %v332_v0 = vpack.c.bf16 %v325_v63, %v324_v62 }
 0x14d   :  { %414 = vmatmul.bf16.vlgmr.msra.gmra.mxu2 %v332_v0 }
 0x14e   :  { %v309_v1 = vpop.f32.mrf.mxu1 }
 0x14f   :  { %v310_v2 = vadd.f32 %v765_v58, %v309_v1 }
 0x151   :  { %v326_v5 = vmax.f32 %v310_v2, 0.0 }
 0x156   :  { %v311_v3 = vpop.f32.mrf.mxu1 }
 0x157   :  { %v312_v4 = vadd.f32 %v765_v58, %v311_v3 }
 0x159   :  { %v327_v6 = vmax.f32 %v312_v4, 0.0 }
 0x15b   :  { %v333_v7 = vpack.c.bf16 %v327_v6, %v326_v5 }
 0x15d   :  { %419 = vmatmul.bf16.gmra.mxu2 %v333_v7 }
 0x15e   :  { %v314_v9 = vpop.f32.mrf.mxu1 }
 0x15f   :  { %v315_v12 = vadd.f32 %v765_v58, %v314_v9 }
 0x161   :  { %v328_v16 = vmax.f32 %v315_v12, 0.0 }
 0x166   :  { %v316_v13 = vpop.f32.mrf.mxu1 }
 0x167   :  { %v317_v14 = vadd.f32 %v765_v58, %v316_v13 }
 0x169   :  { %v329_v17 = vmax.f32 %v317_v14, 0.0 }
 0x16b   :  { %v334_v18 = vpack.c.bf16 %v329_v17, %v328_v16 }
 0x16d   :  { %424 = vmatmul.bf16.gmra.mxu2 %v334_v18 }
 0x16e   :  { %v319_v19 = vpop.f32.mrf.mxu1 }
 0x16f   :  { %v320_v20 = vadd.f32 %v765_v58, %v319_v19 }
 0x171   :  { %v330_v23 = vmax.f32 %v320_v20, 0.0 }
 0x176   :  { %v321_v21 = vpop.f32.mrf.mxu1 }
 0x177   :  { %v322_v22 = vadd.f32 %v765_v58, %v321_v21 }
 0x179   :  { %v331_v24 = vmax.f32 %v322_v22, 0.0 }
 0x17b   :  { %v335_v25 = vpack.c.bf16 %v331_v24, %v330_v23 }
 0x17d   :  { %429 = vmatmul.bf16.gmra.mxu2 %v335_v25 }
 0x1d0   :  { %v415_v30 = vpop.f32.mrf.mxu2 }
 0x1d1   :  { %v416_v32 = vadd.f32 %v766_v31, %v415_v30 }
 0x1d3   :  { %v435_v35 = vmax.f32 %v416_v32, 0.0 }
 0x1d8   :  { %v417_v33 = vpop.f32.mrf.mxu2 }
 0x1d9   :  { %v418_v34 = vadd.f32 %v766_v31, %v417_v33 }
 0x1db   :  { %v436_v36 = vmax.f32 %v418_v34, 0.0 }
 0x1dd   :  { %v443_v37 = vpack.c.bf16 %v436_v36, %v435_v35 }
 0x1df   :  { %523 = vmatmul.bf16.vlgmr.msra.gmra.mxu3 %v443_v37 }
 0x1e0   :  { %v420_v38 = vpop.f32.mrf.mxu2 }
 0x1e1   :  { %v421_v39 = vadd.f32 %v766_v31, %v420_v38 }
 0x1e3   :  { %v437_v42 = vmax.f32 %v421_v39, 0.0 }
 0x1e8   :  { %v422_v40 = vpop.f32.mrf.mxu2 }
 0x1e9   :  { %v423_v41 = vadd.f32 %v766_v31, %v422_v40 }
 0x1eb   :  { %v438_v43 = vmax.f32 %v423_v41, 0.0 }
 0x1ed   :  { %v444_v44 = vpack.c.bf16 %v438_v43, %v437_v42 }
 0x1ef   :  { %528 = vmatmul.bf16.gmra.mxu3 %v444_v44 }
 0x1f0   :  { %v425_v45 = vpop.f32.mrf.mxu2 }
 0x1f1   :  { %v426_v46 = vadd.f32 %v766_v31, %v425_v45 }
 0x1f3   :  { %v439_v49 = vmax.f32 %v426_v46, 0.0 }
 0x1f8   :  { %v427_v47 = vpop.f32.mrf.mxu2 }
 0x1f9   :  { %v428_v48 = vadd.f32 %v766_v31, %v427_v47 }
 0x1fb   :  { %v440_v50 = vmax.f32 %v428_v48, 0.0 }
 0x1fd   :  { %v445_v51 = vpack.c.bf16 %v440_v50, %v439_v49 }
 0x1ff   :  { %533 = vmatmul.bf16.gmra.mxu3 %v445_v51 }
 0x200   :  { %v430_v52 = vpop.f32.mrf.mxu2 }
 0x201   :  { %v431_v53 = vadd.f32 %v766_v31, %v430_v52 }
 0x203   :  { %v441_v56 = vmax.f32 %v431_v53, 0.0 }
 0x208   :  { %v432_v54 = vpop.f32.mrf.mxu2 }
 0x209   :  { %v433_v55 = vadd.f32 %v766_v31, %v432_v54 }
 0x20b   :  { %v442_v57 = vmax.f32 %v433_v55, 0.0 }
 0x20d   :  { %v446_v58 = vpack.c.bf16 %v442_v57, %v441_v56 }
 0x20f   :  { %538 = vmatmul.bf16.gmra.mxu3 %v446_v58 }
 0x262   :  { %v524_v60 = vpop.f32.mrf.mxu3 }
 0x263   :  { %v525_v61 = vadd.f32 %v767_v59, %v524_v60 }
 0x265   :  { %544 = vst [vmem:[#allocation10] sm:$0xff] %v525_v61 }
 0x26a   :  { %v526_v62 = vpop.f32.mrf.mxu3 }
 0x26b   :  { %v527_v63 = vadd.f32 %v767_v59, %v526_v62 }
 0x26d   :  { %545 = vst [vmem:[#allocation10 + $0x8] sm:$0xff] %v527_v63 }
 0x272   :  { %v529_v0 = vpop.f32.mrf.mxu3 }
 0x273   :  { %v530_v1 = vadd.f32 %v767_v59, %v529_v0 }
 0x275   :  { %546 = vst [vmem:[#allocation10 + $0x10] sm:$0xff] %v530_v1 }
 0x27a   :  { %v531_v2 = vpop.f32.mrf.mxu3 }
 0x27b   :  { %v532_v3 = vadd.f32 %v767_v59, %v531_v2 }
 0x27d   :  { %547 = vst [vmem:[#allocation10 + $0x18] sm:$0xff] %v532_v3 }
 0x282   :  { %v534_v4 = vpop.f32.mrf.mxu3 }
 0x283   :  { %v535_v5 = vadd.f32 %v767_v59, %v534_v4 }
 0x285   :  { %548 = vst [vmem:[#allocation10 + $0x20] sm:$0xff] %v535_v5 }
 0x28a   :  { %v536_v6 = vpop.f32.mrf.mxu3 }
 0x28b   :  { %v537_v7 = vadd.f32 %v767_v59, %v536_v6 }
 0x28d   :  { %549 = vst [vmem:[#allocation10 + $0x28] sm:$0xff] %v537_v7 }
 0x292   :  { %v539_v8 = vpop.f32.mrf.mxu3 }
 0x293   :  { %v540_v9 = vadd.f32 %v767_v59, %v539_v8 }
 0x295   :  { %550 = vst [vmem:[#allocation10 + $0x30] sm:$0xff] %v540_v9 }
 0x29a   :  { %v541_v10 = vpop.f32.mrf.mxu3 }
 0x29b   :  { %v542_v11 = vadd.f32 %v767_v59, %v541_v10 }
 0x29d   :  { %551 = vst [vmem:[#allocation10 + $0x38] sm:$0xff] %v542_v11 }
 0x29e   :  { %564 = dma.vmem_to_hbm [thread:$0]  %s557_s15, 1024, %s559_s18, [#allocation4], %s905_s19, %s905_s19, %s906_s20  }
 0x29f   :  { %894 = dma.done.wait [#allocation4], 1024  }
 0x2a0   :  { %895 = vsyncadd [#allocation4], 4294966272 }
 0x2a1   :  { %569 = vsyncpa [#allocation3], 1 }
 0x2a2   :  { %570 = vsyncpa [#allocation6], 1 }
 0x2a3   :  { %571 = vsyncpa [#allocation9], 1 }
 0x2a4   :  { %572 = vsyncpa [#allocation4], 1 }

</bundles_post_ra>
